<compile_context>
chip_gen: v7x
topology: tpu7x:2x2x1
jax: 0.10.0
libtpu: 0.0.40
codegen_flags: <defaults>
</compile_context>

<pallas_src>
import functools

import jax
import jax.numpy as jnp
from jax import lax
from jax.experimental import pallas as pl
from jax.experimental.pallas import tpu as pltpu

LANE = 128
# Total input-block bytes across both streams per pipeline buffer.  4 MiB
# => ~8 MiB double-buffered for 2 streams.  On v6e/v7x this can be raised
# (8-16 MiB) together with _VMEM_LIMIT_BYTES for a few extra % of roofline.
_TARGET_BLOCK_BYTES = 4 * 1024 * 1024
_VMEM_LIMIT_BYTES = 32 * 1024 * 1024


def _cdiv(a, b):
    return (a + b - 1) // b


def _round_up(a, b):
    return _cdiv(a, b) * b


def _row_alignment(*dtypes):
    """Sublane-tile row alignment: f32 -> 8, bf16 -> 16, int8/fp8 -> 32."""
    align = 8
    for dt in dtypes:
        itemsize = max(1, jnp.dtype(dt).itemsize)
        align = max(align, 8 * (4 // itemsize))
    return align


def _choose_tiling(rows, bytes_per_row, row_align, block_rows=None):
    """Pick (n_cores, steps_per_core, block_rows)."""
    if rows == 0:
        return 0, 0, 0
    if block_rows is None:
        br = _TARGET_BLOCK_BYTES // bytes_per_row
    else:
        br = block_rows
    br = max(row_align, (br // row_align) * row_align)
    br = min(br, _round_up(rows, row_align))
    nblocks = _cdiv(rows, br)
    n_cores = 2 if nblocks >= 4 else 1   # leading "parallel" axis (v7x 2-TC)
    steps = _cdiv(nblocks, n_cores)
    return n_cores, steps, br


def _tversky_sums_kernel(x_ref, t_ref, o_ref, *, steps, br, rows, need_mask):
    """Accumulate lane/sublane-parallel partial sums into o_ref (24, 128).

    o_ref rows  0..7  : sum(targets)
    o_ref rows  8..15 : sum(sigmoid(logits))
    o_ref rows 16..23 : sum(sigmoid(logits) * targets)

    FP/FN are linear in these sums and are recovered in the JAX epilogue.
    """
    c = pl.program_id(0)
    i = pl.program_id(1)

    @pl.when(i == 0)
    def _():
        o_ref[...] = jnp.zeros_like(o_ref)

    x = x_ref[...].astype(jnp.float32)
    t = t_ref[...].astype(jnp.float32)
    p = jax.nn.sigmoid(x)          # EUP; VPU/MXU slots stay free

    if need_mask:
        # Zero rows past the end of the flattened input: the partial last
        # block and any over-range block on the second core (whose index_map
        # is clamped to the last real block).  jnp.where keeps any garbage in
        # the padded region (incl. NaN) out of the sums.
        start = (c * steps + i) * br
        row_ids = start + lax.broadcasted_iota(jnp.int32, (br, LANE), 0)
        valid = row_ids < rows
        t = jnp.where(valid, t, 0.0)
        p = jnp.where(valid, p, 0.0)

    tp = p * t
    k = br // 8
    # (br,128)->(br//8,8,128) is layout-preserving; the axis-0 sum is pure VPU
    # vreg adds (no XLU), and the (24,128) accumulator keeps the VMEM-resident
    # output lane-dense with a single add/store per step.
    sum_t = t.reshape(k, 8, LANE).sum(axis=0)
    sum_p = p.reshape(k, 8, LANE).sum(axis=0)
    sum_tp = tp.reshape(k, 8, LANE).sum(axis=0)
    o_ref[...] += jnp.concatenate([sum_t, sum_p, sum_tp], axis=0)


@functools.partial(
    jax.jit,
    static_argnames=("alpha", "beta", "gamma", "epsilon", "block_rows"))
def binary_weighted_focal_tversky_loss(inputs, targets, *, alpha=0.5, beta=0.5,
                                       gamma=1.0, epsilon=1e-7, block_rows=None):
    x = inputs.reshape(-1)
    t = targets.reshape(-1)
    n = x.shape[0]

    rows = n // LANE
    n_main = rows * LANE

    row_align = _row_alignment(x.dtype, t.dtype)
    bytes_per_row = LANE * (x.dtype.itemsize + t.dtype.itemsize)
    n_cores, steps, br = _choose_tiling(rows, bytes_per_row, row_align, block_rows)

    sum_t = jnp.float32(0.0)
    sum_p = jnp.float32(0.0)
    sum_tp = jnp.float32(0.0)

    if rows > 0:
        # Free reshape when n is a multiple of 128 (the common case); otherwise
        # the <128-elements-short prefix slice is materialized once and only
        # the tiny tail is handled in plain JAX below.
        xm = (x if n_main == n else x[:n_main]).reshape(rows, LANE)
        tm = (t if n_main == n else t[:n_main]).reshape(rows, LANE)

        nblocks = _cdiv(rows, br)
        # Mask only when grid coverage (n_cores*steps*br rows) overhangs the
        # real row count (partial last block / uneven 2-core split).
        need_mask = (n_cores * steps * br) != rows

        def in_map(c, i):
            # Clamp so over-range grid points (uneven core split) re-read the
            # last real block; the in-kernel row mask zeroes their contribution.
            return (jnp.minimum(c * steps + i, nblocks - 1), 0)

        kernel = functools.partial(_tversky_sums_kernel, steps=steps, br=br,
                                   rows=rows, need_mask=need_mask)

        sums = pl.pallas_call(
            kernel,
            out_shape=jax.ShapeDtypeStruct((n_cores, 24, LANE), jnp.float32),
            grid=(n_cores, steps),
            in_specs=[
                pl.BlockSpec((br, LANE), in_map),   # logits, native dtype
                pl.BlockSpec((br, LANE), in_map),   # targets, native dtype
            ],
            out_specs=pl.BlockSpec((None, 24, LANE), lambda c, i: (c, 0, 0)),
            compiler_params=pltpu.CompilerParams(
                # On v7x, (pltpu.CORE_PARALLEL, pltpu.ARBITRARY) can be used to
                # guarantee the 2-way TensorCore split of the leading axis.
                dimension_semantics=("parallel", "arbitrary"),
                vmem_limit_bytes=_VMEM_LIMIT_BYTES,
            ),
        )(xm, tm)

        sum_t = jnp.sum(sums[:, 0:8, :])
        sum_p = jnp.sum(sums[:, 8:16, :])
        sum_tp = jnp.sum(sums[:, 16:24, :])

    if n_main < n:
        # Sub-128-element remainder: a handful of elements, plain JAX.
        xt = x[n_main:].astype(jnp.float32)
        tt = t[n_main:].astype(jnp.float32)
        pt = jax.nn.sigmoid(xt)
        sum_t = sum_t + tt.sum()
        sum_p = sum_p + pt.sum()
        sum_tp = sum_tp + (pt * tt).sum()

    # O(1) scalar epilogue (class weights, Tversky index, focal power).
    TP = sum_tp
    FP = sum_p - sum_tp          # sum((1 - t) * p)
    FN = sum_t - sum_tp          # sum(t * (1 - p))
    num_positive = sum_t
    num_negative = jnp.float32(n) - num_positive
    weight_positive = num_negative / (num_positive + epsilon)
    weight_negative = num_positive / (num_negative + epsilon)
    tversky_index = (TP + epsilon) / (
        TP + alpha * FP * weight_positive + beta * FN * weight_negative + epsilon)
    return (1.0 - tversky_index) ** gamma


def _reference(inputs, targets, alpha=0.5, beta=0.5, gamma=1.0, epsilon=1e-7):
    p = jax.nn.sigmoid(inputs.astype(jnp.float32)).reshape(-1)
    t = targets.astype(jnp.float32).reshape(-1)
    num_positive = t.sum()
    num_negative = t.size - num_positive
    w_pos = num_negative / (num_positive + epsilon)
    w_neg = num_positive / (num_negative + epsilon)
    TP = (p * t).sum()
    FP = ((1 - t) * p).sum()
    FN = (t * (1 - p)).sum()
    ti = (TP + epsilon) / (TP + alpha * FP * w_pos + beta * FN * w_neg + epsilon)
    return (1.0 - ti) ** gamma


if __name__ == "__main__":
    root = jax.random.PRNGKey(0)

    def check(tag, key, shape, x_dtype=jnp.float32, block_rows=None,
              rtol=1e-5, atol=1e-6):
        k1, k2 = jax.random.split(key)
        x = jax.random.normal(k1, shape, dtype=jnp.float32).astype(x_dtype)
        t = jax.random.bernoulli(k2, 0.3, shape).astype(jnp.float32)
        got = binary_weighted_focal_tversky_loss(x, t, block_rows=block_rows)
        got = jax.block_until_ready(got)
        ref = _reference(x, t)
        assert jnp.allclose(got, ref, rtol=rtol, atol=atol), (tag, got, ref)
        return got

    keys = jax.random.split(root, 4)
    # Primary example: NCHW as the PyTorch module would receive it.
    check("base", keys[0], (2, 4, 16, 16))
    # Partial last block (in-kernel row mask) + sub-128-element tail in JAX.
    check("mask_tail", keys[1], (3, 2, 30, 16))
    # Multi-block grid, 2-way core split with an uneven (clamped) last block.
    check("multiblock", keys[2], (2, 4, 34, 16), block_rows=8)
    # bf16 logits stream (kernel upcasts per block; no wrapper-side cast).
    check("bf16", keys[3], (2, 4, 16, 16), x_dtype=jnp.bfloat16)

    print("KERNEL_OK")
</pallas_src>

<mosaic_0001>
module attributes {stable_mosaic.version = 11 : i64} {
  func.func @_tversky_sums_kernel(%arg0: i32, %arg1: i32, %arg2: memref<16x128xf32, #tpu.memory_space<vmem>>, %arg3: memref<16x128xf32, #tpu.memory_space<vmem>>, %arg4: memref<1x24x128xf32, #tpu.memory_space<vmem>>) attributes {dimension_semantics = [#tpu.dimension_semantics<parallel>, #tpu.dimension_semantics<arbitrary>], iteration_bounds = array<i64: 1, 1>, scalar_prefetch = 0 : i64, scratch_operands = 0 : i64, tpu.core_type = #tpu.core_type<tc>, window_params = [{transform_indices = @transform_0, window_bounds = array<i64: 16, 128>}, {transform_indices = @transform_1, window_bounds = array<i64: 16, 128>}, {transform_indices = @transform_2, window_bounds = array<i64: 1, 24, 128>}]} {
    %c0_i32 = arith.constant 0 : i32
    %0 = arith.cmpi eq, %arg1, %c0_i32 : i32
    %1 = arith.extui %0 : i1 to i32
    %c0_i32_0 = arith.constant 0 : i32
    %2 = arith.cmpi ne, %1, %c0_i32_0 : i32
    scf.if %2 {
      %cst_13 = arith.constant 0.000000e+00 : f32
      %24 = vector.broadcast %cst_13 : f32 to vector<24x128xf32>
      %c0_14 = arith.constant 0 : index
      %c0_15 = arith.constant 0 : index
      %c0_16 = arith.constant 0 : index
      %25 = vector.load %arg4[%c0_14, %c0_15, %c0_16] : memref<1x24x128xf32, #tpu.memory_space<vmem>>, vector<1x24x128xf32>
      %26 = vector.shape_cast %25 : vector<1x24x128xf32> to vector<24x128xf32>
      %27 = vector.shape_cast %24 : vector<24x128xf32> to vector<1x24x128xf32>
      tpu.vector_store %arg4[%c0_14, %c0_15, %c0_16], %27 {strides = array<i32>} : memref<1x24x128xf32, #tpu.memory_space<vmem>>, vector<1x24x128xf32>,
    } else {
    }
    %c0 = arith.constant 0 : index
    %c0_1 = arith.constant 0 : index
    %3 = vector.load %arg2[%c0, %c0_1] : memref<16x128xf32, #tpu.memory_space<vmem>>, vector<16x128xf32>
    %c0_2 = arith.constant 0 : index
    %c0_3 = arith.constant 0 : index
    %4 = vector.load %arg3[%c0_2, %c0_3] : memref<16x128xf32, #tpu.memory_space<vmem>>, vector<16x128xf32>
    %5 = arith.negf %3 : vector<16x128xf32>
    %6 = math.exp %5 : vector<16x128xf32>
    %cst = arith.constant 1.000000e+00 : f32
    %7 = vector.broadcast %cst : f32 to vector<16x128xf32>
    %8 = arith.addf %7, %6 : vector<16x128xf32>
    %9 = arith.divf %7, %8 : vector<16x128xf32>
    %10 = arith.mulf %9, %4 : vector<16x128xf32>
    %11 = vector.shape_cast %4 : vector<16x128xf32> to vector<2x8x128xf32>
    %cst_4 = arith.constant dense<0.000000e+00> : vector<8x128xf32>
    %12 = vector.multi_reduction <add>, %11, %cst_4 [0] : vector<2x8x128xf32> to vector<8x128xf32>
    %13 = vector.shape_cast %9 : vector<16x128xf32> to vector<2x8x128xf32>
    %cst_5 = arith.constant dense<0.000000e+00> : vector<8x128xf32>
    %14 = vector.multi_reduction <add>, %13, %cst_5 [0] : vector<2x8x128xf32> to vector<8x128xf32>
    %15 = vector.shape_cast %10 : vector<16x128xf32> to vector<2x8x128xf32>
    %cst_6 = arith.constant dense<0.000000e+00> : vector<8x128xf32>
    %16 = vector.multi_reduction <add>, %15, %cst_6 [0] : vector<2x8x128xf32> to vector<8x128xf32>
    %c0_7 = arith.constant 0 : index
    %c0_8 = arith.constant 0 : index
    %c0_9 = arith.constant 0 : index
    %17 = vector.load %arg4[%c0_7, %c0_8, %c0_9] : memref<1x24x128xf32, #tpu.memory_space<vmem>>, vector<1x24x128xf32>
    %18 = vector.shape_cast %17 : vector<1x24x128xf32> to vector<24x128xf32>
    %19 = tpu.concatenate %12, %14, %16 in 0 : vector<8x128xf32>, vector<8x128xf32>, vector<8x128xf32> -> vector<24x128xf32>
    %20 = arith.addf %18, %19 : vector<24x128xf32>
    %c0_10 = arith.constant 0 : index
    %c0_11 = arith.constant 0 : index
    %c0_12 = arith.constant 0 : index
    %21 = vector.load %arg4[%c0_10, %c0_11, %c0_12] : memref<1x24x128xf32, #tpu.memory_space<vmem>>, vector<1x24x128xf32>
    %22 = vector.shape_cast %21 : vector<1x24x128xf32> to vector<24x128xf32>
    %23 = vector.shape_cast %20 : vector<24x128xf32> to vector<1x24x128xf32>
    tpu.vector_store %arg4[%c0_10, %c0_11, %c0_12], %23 {strides = array<i32>} : memref<1x24x128xf32, #tpu.memory_space<vmem>>, vector<1x24x128xf32>,
    return
  }
  func.func @transform_0(%arg0: i32, %arg1: i32) -> (i32, i32) {
    %c1_i32 = arith.constant 1 : i32
    %0 = arith.muli %arg0, %c1_i32 : i32
    %1 = arith.addi %0, %arg1 : i32
    %c0_i32 = arith.constant 0 : i32
    %2 = arith.minsi %1, %c0_i32 : i32
    %c0_i32_0 = arith.constant 0 : i32
    %c0_i32_1 = arith.constant 0 : i32
    return %2, %c0_i32_0 : i32, i32
  }
  func.func @transform_1(%arg0: i32, %arg1: i32) -> (i32, i32) {
    %c1_i32 = arith.constant 1 : i32
    %0 = arith.muli %arg0, %c1_i32 : i32
    %1 = arith.addi %0, %arg1 : i32
    %c0_i32 = arith.constant 0 : i32
    %2 = arith.minsi %1, %c0_i32 : i32
    %c0_i32_0 = arith.constant 0 : i32
    %c0_i32_1 = arith.constant 0 : i32
    return %2, %c0_i32_0 : i32, i32
  }
  func.func @transform_2(%arg0: i32, %arg1: i32) -> (i32, i32, i32) {
    %c0_i32 = arith.constant 0 : i32
    %c0_i32_0 = arith.constant 0 : i32
    %c0_i32_1 = arith.constant 0 : i32
    return %arg0, %c0_i32, %c0_i32_0 : i32, i32, i32
  }
}

</mosaic_0001>

<bundles_post_ra>
// kernel: binary_weighted_focal_tversky_loss.1
= control target key start
LH: loop header
LB: loop body
LE: loop exit
PB: predicated region body
PF: predicated region fallthrough
CT: control target
= control target key end

     0   :  { %s175_s1 = inlined_call_operand.vmem [shape: f32[16,128], index: 1, kind: input, shape index: {}]   ;;  %s176_s0 = inlined_call_operand.vmem [shape: f32[16,128], index: 0, kind: input, shape index: {}]   ;;  %s177_s2 = inlined_call_operand.vmem [shape: f32[1,24,128], index: 2, kind: output, shape index: {}]  }
   0x1   :  { %v84_v0 = vld [vmem:[%s175_s1] sm:$0xff]  ;;  %v85_v1 = vld [vmem:[%s175_s1 + $0x8] sm:$0xff] }
   0x2   :  { %v82_v2 = vld [vmem:[%s176_s0] sm:$0xff]  ;;  %v100_v3 = vadd.f32 %v85_v1, %v84_v0  ;;  %v83_v4 = vld [vmem:[%s176_s0 + $0x8] sm:$0xff] }
   0x3   :  { %v128_v5 = vmul.f32 -1.442695, %v82_v2  ;;  %v129_v6 = vmul.f32 -1.442695, %v83_v4 }
   0x4   :  { %109 = vst [vmem:[%s177_s2] sm:$0xff] %v100_v3 }
   0x5   :  { %131 = vpow2.f32 %v128_v5 }
   0x6   :  { %133 = vpow2.f32 %v129_v6 }
   0xf   :  { %v132_v7 = vpop.eup %131 }
  0x10   :  { %v134_v8 = vpop.eup %133  ;;  %v92_v9 = vadd.f32 1.0, %v132_v7 }
  0x11   :  { %v93_v10 = vadd.f32 1.0, %v134_v8 }
  0x12   :  { %135 = vrcp.f32 %v92_v9 }
  0x13   :  { %137 = vrcp.f32 %v93_v10 }
  0x1c   :  { %v136_v11 = vpop.eup %135 }
  0x1d   :  { %v138_v12 = vpop.eup %137  ;;  %v98_v13 = vmul.f32 %v136_v11, %v84_v0 }
  0x1e   :  { %v101_v14 = vadd.f32 %v138_v12, %v136_v11  ;;  %v99_v15 = vmul.f32 %v138_v12, %v85_v1 }
  0x20   :  { %v102_v16 = vadd.f32 %v99_v15, %v98_v13  ;;  %110 = vst [vmem:[%s177_s2 + $0x8] sm:$0xff] %v101_v14 }
  0x22   :  { %111 = vst [vmem:[%s177_s2 + $0x10] sm:$0xff] %v102_v16 }

</bundles_post_ra>
